<compile_context>
chip_gen: v5e
topology: v5e:2x2
jax: 0.10.0
libtpu: 0.0.40
codegen_flags: <defaults>
</compile_context>

<pallas_src>
import functools

import jax
import jax.numpy as jnp
from jax.experimental import pallas as pl
from jax.experimental.pallas import tpu as pltpu


def _round_up(x, m):
    return (x + m - 1) // m * m


def _cdiv(a, b):
    return (a + b - 1) // b


def _probe_single_buffer_support():
    # pipeline_mode=pl.Buffered(1) lets a constant-index operand skip its second
    # pipeline buffer.  Probe construction once so jax versions without the
    # kwarg fall back to plain (double-buffered) BlockSpecs instead of erroring.
    if not hasattr(pl, "Buffered"):
        return False
    try:
        pl.BlockSpec((8, 128), lambda i: (0, 0), pipeline_mode=pl.Buffered(1))
        return True
    except Exception:
        return False


_SINGLE_BUFFER_OK = _probe_single_buffer_support()
# Only single-buffer operands big enough for the VMEM saving to matter; tiny
# operands (and the small-shape test config) stay on the default, most
# exercised lowering path.
_SINGLE_BUFFER_MIN_BYTES = 512 * 1024


def _resident_spec(block_shape, index_map, nbytes):
    if _SINGLE_BUFFER_OK and nbytes >= _SINGLE_BUFFER_MIN_BYTES:
        return pl.BlockSpec(block_shape, index_map, pipeline_mode=pl.Buffered(1))
    return pl.BlockSpec(block_shape, index_map)


def _vmem_budget():
    cap = 64 * 1024 * 1024  # conservative fallback = v7x physical VMEM
    try:
        cap = int(getattr(pltpu.get_tpu_info(), "vmem_capacity_bytes", cap))
    except Exception:
        pass
    budget = (cap * 9) // 20                                   # ~45% for our blocks
    limit = max(min((cap * 11) // 20, cap - (4 << 20)), 16 << 20)
    return budget, limit


def _patch_embed_kernel(p_ref, w_ref, b_ref, o_ref):
    # One tile of patch rows x resident weight -> one output tile.
    acc = jnp.dot(p_ref[...], w_ref[...], preferred_element_type=jnp.float32)
    o_ref[...] = (acc + b_ref[...].astype(jnp.float32)).astype(o_ref.dtype)


def _patch_embed_kernel_ktiled(p_ref, w_ref, b_ref, o_ref, acc_ref):
    # Same GEMM with the reduction (K) axis tiled across the last grid axis.
    @pl.when(pl.program_id(1) == 0)
    def _():
        acc_ref[...] = jnp.zeros_like(acc_ref)

    acc_ref[...] += jnp.dot(p_ref[...], w_ref[...],
                            preferred_element_type=jnp.float32)

    @pl.when(pl.program_id(1) == pl.num_programs(1) - 1)
    def _():
        o_ref[...] = (acc_ref[...] + b_ref[...].astype(jnp.float32)).astype(o_ref.dtype)


def prepare_patch_embed_params(weight, bias, *, use_bf16_mxu=True):
    """Lay out Conv2d params once for the kernel.

    weight: (E, C, p, p), bias: (E,)  ->  w2d: (K, N), b2d: (1, N) with
    K = C*p*p and N = round_up(E, 128) (lane-dense output stores).  Done once at
    model setup so the per-call forward does no transpose / pad / extra HBM trip.
    """
    E, C, ph, pw = weight.shape
    K = C * ph * pw
    N = _round_up(E, 128)
    w2d = jnp.asarray(weight).reshape(E, K).T          # (K, E)
    b = jnp.asarray(bias, dtype=jnp.float32)
    if N != E:
        w2d = jnp.pad(w2d, ((0, 0), (0, N - E)))
        b = jnp.pad(b, (0, N - E))
    if use_bf16_mxu:
        w2d = w2d.astype(jnp.bfloat16)
    return w2d, b.reshape(1, N)


@functools.partial(jax.jit,
                   static_argnames=("patch_size", "embed_dim", "block_m", "block_k"))
def patch_embed_forward(x, w2d, b2d, *, patch_size, embed_dim,
                        block_m=1024, block_k=None):
    """x: (B, C, H, W) NCHW -> (B, num_patches, embed_dim).

    w2d/b2d come from prepare_patch_embed_params.  The MXU operand dtype is
    w2d.dtype (bf16 by default); accumulation and the bias epilogue are f32.
    """
    B, C, H, W = x.shape
    p = patch_size
    assert H % p == 0 and W % p == 0, "image size must be divisible by patch size"
    gh, gw = H // p, W // p
    num_patches = gh * gw
    M = B * num_patches
    K = C * p * p
    Kw, N = w2d.shape
    assert Kw == K and N == _round_up(embed_dim, 128)

    out_dtype = x.dtype
    mxu_dtype = w2d.dtype
    in_item = jnp.dtype(mxu_dtype).itemsize
    out_item = jnp.dtype(out_dtype).itemsize

    # --- glue: non-overlapping patch extraction in (c, kh, kw) order ---
    # (cast first so the materialized (M, K) im2col is already the narrow dtype)
    patches = x.astype(mxu_dtype).reshape(B, C, gh, p, gw, p)
    patches = patches.transpose(0, 2, 4, 1, 3, 5).reshape(M, K)

    budget, vmem_limit = _vmem_budget()
    w_buf = 1 if (_SINGLE_BUFFER_OK and
                  K * N * in_item >= _SINGLE_BUFFER_MIN_BYTES) else 2
    bias_bytes = 2 * N * 4  # bias stays tiny; budget it double-buffered

    def resident_bytes(tm):
        return (2 * tm * K * in_item          # patch tiles (double-buffered)
                + w_buf * K * N * in_item     # resident weight
                + bias_bytes
                + 2 * tm * N * out_item)      # output tiles

    def ktiled_bytes(tm, tk):
        return (2 * tm * tk * in_item
                + 2 * tk * N * in_item
                + bias_bytes
                + 2 * tm * N * out_item
                + tm * N * 4)                 # f32 accumulator scratch

    # MXU-aligned row tile; never exceed (8-rounded) M.  If a single tile covers
    # all of M but M is big enough, split it in two so the parallel M grid axis
    # has >= 2 steps for v7x's two TensorCores.
    TM = min(block_m, _round_up(M, 8))
    if _cdiv(M, TM) == 1 and M >= 16:
        TM = _round_up(_cdiv(M, 2), 8)

    k_tiling = (block_k is not None and block_k < K) or resident_bytes(8) > budget

    cost = pl.CostEstimate(
        flops=2 * M * K * N,
        transcendentals=0,
        bytes_accessed=(M * K * in_item + K * N * in_item + N * 4
                        + M * N * out_item),
    )

    if not k_tiling:
        while TM > 8 and resident_bytes(TM) > budget:
            TM = max(8, _round_up(TM // 2, 8))
        grid_m = _cdiv(M, TM)
        out2d = pl.pallas_call(
            _patch_embed_kernel,
            out_shape=jax.ShapeDtypeStruct((M, N), out_dtype),
            grid_spec=pltpu.PrefetchScalarGridSpec(
                num_scalar_prefetch=0,
                grid=(grid_m,),
                in_specs=[
                    pl.BlockSpec((TM, K), lambda i: (i, 0)),              # patches
                    _resident_spec((K, N), lambda i: (0, 0),              # weight
                                   K * N * in_item),
                    _resident_spec((1, N), lambda i: (0, 0), N * 4),      # bias
                ],
                out_specs=pl.BlockSpec((TM, N), lambda i: (i, 0)),
            ),
            compiler_params=pltpu.CompilerParams(
                dimension_semantics=("parallel",),
                vmem_limit_bytes=vmem_limit,
            ),
            cost_estimate=cost,
        )(patches, w2d, b2d)
    else:
        # Resident weight too big (or K tiling forced): tile K, accumulate in f32.
        TK = block_k if block_k is not None else 1024
        TK = max(128, min(_round_up(TK, 128), _round_up(K, 128)))
        while TM > 8 and ktiled_bytes(TM, TK) > budget:
            TM = max(8, _round_up(TM // 2, 8))
        while TK > 128 and ktiled_bytes(TM, TK) > budget:
            TK = max(128, _round_up(TK // 2, 128))
        # Zero-pad the reduction axis so boundary K tiles never fold OOB garbage
        # into the accumulation (the M axis may read OOB rows -- that is safe,
        # the K axis is not).
        Kp = _round_up(K, TK)
        if Kp != K:
            patches = jnp.pad(patches, ((0, 0), (0, Kp - K)))
            w2d = jnp.pad(w2d, ((0, Kp - K), (0, 0)))
        grid_m = _cdiv(M, TM)
        grid_k = Kp // TK
        out2d = pl.pallas_call(
            _patch_embed_kernel_ktiled,
            out_shape=jax.ShapeDtypeStruct((M, N), out_dtype),
            grid_spec=pltpu.PrefetchScalarGridSpec(
                num_scalar_prefetch=0,
                grid=(grid_m, grid_k),
                in_specs=[
                    pl.BlockSpec((TM, TK), lambda i, k: (i, k)),
                    pl.BlockSpec((TK, N), lambda i, k: (k, 0)),
                    _resident_spec((1, N), lambda i, k: (0, 0), N * 4),
                ],
                out_specs=pl.BlockSpec((TM, N), lambda i, k: (i, 0)),
                scratch_shapes=[pltpu.VMEM((TM, N), jnp.float32)],
            ),
            compiler_params=pltpu.CompilerParams(
                dimension_semantics=("parallel", "arbitrary"),
                vmem_limit_bytes=vmem_limit,
            ),
            cost_estimate=cost,
        )(patches, w2d, b2d)

    if N != embed_dim:
        out2d = out2d[:, :embed_dim]
    return out2d.reshape(B, num_patches, embed_dim)


def _reference_forward(x, weight, bias, patch_size, mxu_dtype=None):
    """Pure-JAX reference of the PyTorch forward (conv via im2col + matmul)."""
    B, C, H, W = x.shape
    E = weight.shape[0]
    p = patch_size
    gh, gw = H // p, W // p
    patches = x.reshape(B, C, gh, p, gw, p).transpose(0, 2, 4, 1, 3, 5)
    patches = patches.reshape(B * gh * gw, C * p * p)
    w2d = weight.reshape(E, -1).T
    if mxu_dtype is not None:
        patches = patches.astype(mxu_dtype)
        w2d = w2d.astype(mxu_dtype)
    out = jnp.dot(patches, w2d, preferred_element_type=jnp.float32)
    out = out + bias[None, :].astype(jnp.float32)
    return out.reshape(B, gh * gw, E).astype(x.dtype)


if __name__ == "__main__":
    key = jax.random.PRNGKey(0)

    # Small shapes consistent with the module: img_size=16, patch_size=4,
    # in_c=4, embed_dim=32, batch=2  -> num_patches = (16/4)^2 = 16.
    B, C, H, W = 2, 4, 16, 16
    P = 4
    E = 32
    kx, kw, kb, kx2, kw2 = jax.random.split(key, 5)
    x = jax.random.normal(kx, (B, C, H, W), dtype=jnp.float32)
    weight = jax.random.normal(kw, (E, C, P, P), dtype=jnp.float32) * 0.02
    bias = jax.random.normal(kb, (E,), dtype=jnp.float32) * 0.02

    # --- default bf16-MXU path (resident weight) ---
    w2d, b2d = prepare_patch_embed_params(weight, bias, use_bf16_mxu=True)
    out = patch_embed_forward(x, w2d, b2d, patch_size=P, embed_dim=E)
    out = jax.block_until_ready(out)
    assert out.shape == (B, (H // P) * (W // P), E), out.shape
    ref_bf16 = _reference_forward(x, weight, bias, P, mxu_dtype=jnp.bfloat16)
    assert jnp.allclose(out, ref_bf16, atol=1e-3, rtol=1e-3), "bf16 path mismatch"

    # --- strict f32-parity path ---
    w2d32, b2d32 = prepare_patch_embed_params(weight, bias, use_bf16_mxu=False)
    out32 = jax.block_until_ready(
        patch_embed_forward(x, w2d32, b2d32, patch_size=P, embed_dim=E))
    ref32 = _reference_forward(x, weight, bias, P)
    assert jnp.allclose(out32, ref32, atol=2e-3, rtol=2e-3), "f32 path mismatch"

    # --- K-tiled (f32 accumulator) path, forced via block_k on a larger-K config ---
    C2 = 16  # K = C2*P*P = 256 -> two K tiles of 128
    x2 = jax.random.normal(kx2, (B, C2, H, W), dtype=jnp.float32)
    weight2 = jax.random.normal(kw2, (E, C2, P, P), dtype=jnp.float32) * 0.02
    w2d_2, b2d_2 = prepare_patch_embed_params(weight2, bias, use_bf16_mxu=True)
    out_k = jax.block_until_ready(
        patch_embed_forward(x2, w2d_2, b2d_2, patch_size=P, embed_dim=E,
                            block_k=128))
    ref_k = _reference_forward(x2, weight2, bias, P, mxu_dtype=jnp.bfloat16)
    assert jnp.allclose(out_k, ref_k, atol=1e-3, rtol=1e-3), "K-tiled path mismatch"

    print("KERNEL_OK")
</pallas_src>

<mosaic_0001>
module attributes {stable_mosaic.version = 11 : i64} {
  func.func @_patch_embed_kernel(%arg0: i32, %arg1: memref<16x64xbf16, #tpu.memory_space<vmem>>, %arg2: memref<64x128xbf16, #tpu.memory_space<vmem>>, %arg3: memref<1x128xf32, #tpu.memory_space<vmem>>, %arg4: memref<16x128xf32, #tpu.memory_space<vmem>>) attributes {dimension_semantics = [#tpu.dimension_semantics<parallel>], iteration_bounds = array<i64: 2>, scalar_prefetch = 0 : i64, scratch_operands = 0 : i64, tpu.core_type = #tpu.core_type<tc>, window_params = [{transform_indices = @transform_0, window_bounds = array<i64: 16, 64>}, {pipeline_mode = #tpu.pipeline_mode<synchronous>, transform_indices = @transform_1, window_bounds = array<i64: 64, 128>}, {pipeline_mode = #tpu.pipeline_mode<synchronous>, transform_indices = @transform_2, window_bounds = array<i64: 1, 128>}, {transform_indices = @transform_3, window_bounds = array<i64: 16, 128>}]} {
    %c0 = arith.constant 0 : index
    %c0_0 = arith.constant 0 : index
    %0 = vector.load %arg1[%c0, %c0_0] : memref<16x64xbf16, #tpu.memory_space<vmem>>, vector<16x64xbf16>
    %c0_1 = arith.constant 0 : index
    %c0_2 = arith.constant 0 : index
    %1 = vector.load %arg2[%c0_1, %c0_2] : memref<64x128xbf16, #tpu.memory_space<vmem>>, vector<64x128xbf16>
    %cst = arith.constant dense<0.000000e+00> : vector<16x128xf32>
    %2 = tpu.matmul %0, %1, %cst {dimension_numbers = #tpu.dot_dimension_numbers<[1], [0], [0], [1], [0, 0, 1, 1], [], []>} : vector<16x64xbf16>, vector<64x128xbf16>, vector<16x128xf32> -> vector<16x128xf32>
    %c0_3 = arith.constant 0 : index
    %c0_4 = arith.constant 0 : index
    %3 = vector.load %arg3[%c0_3, %c0_4] : memref<1x128xf32, #tpu.memory_space<vmem>>, vector<1x128xf32>
    %4 = vector.broadcast %3 : vector<1x128xf32> to vector<16x128xf32>
    %5 = arith.addf %2, %4 : vector<16x128xf32>
    %c0_5 = arith.constant 0 : index
    %c0_6 = arith.constant 0 : index
    %6 = vector.load %arg4[%c0_5, %c0_6] : memref<16x128xf32, #tpu.memory_space<vmem>>, vector<16x128xf32>
    tpu.vector_store %arg4[%c0_5, %c0_6], %5 {strides = array<i32>} : memref<16x128xf32, #tpu.memory_space<vmem>>, vector<16x128xf32>,
    return
  }
  func.func @transform_0(%arg0: i32) -> (i32, i32) {
    %c0_i32 = arith.constant 0 : i32
    %c0_i32_0 = arith.constant 0 : i32
    return %arg0, %c0_i32 : i32, i32
  }
  func.func @transform_1(%arg0: i32) -> (i32, i32) {
    %c0_i32 = arith.constant 0 : i32
    %c0_i32_0 = arith.constant 0 : i32
    %c0_i32_1 = arith.constant 0 : i32
    return %c0_i32, %c0_i32_0 : i32, i32
  }
  func.func @transform_2(%arg0: i32) -> (i32, i32) {
    %c0_i32 = arith.constant 0 : i32
    %c0_i32_0 = arith.constant 0 : i32
    %c0_i32_1 = arith.constant 0 : i32
    return %c0_i32, %c0_i32_0 : i32, i32
  }
  func.func @transform_3(%arg0: i32) -> (i32, i32) {
    %c0_i32 = arith.constant 0 : i32
    %c0_i32_0 = arith.constant 0 : i32
    return %arg0, %c0_i32 : i32, i32
  }
}

</mosaic_0001>

<bundles_post_ra>
// kernel: patch_embed_forward.1
= control target key start
LH: loop header
LB: loop body
LE: loop exit
PB: predicated region body
PF: predicated region fallthrough
CT: control target
= control target key end

     0   :  { %8 = vsyncpa [#allocation3], 0  ;;  %s580_s0 = inlined_call_operand.vmem [shape: bf16[32,64], index: 0, kind: input, shape index: {}]   ;;  %s581_s1 = inlined_call_operand.vmem [shape: bf16[64,128], index: 1, kind: input, shape index: {}]   ;;  %s582_s2 = inlined_call_operand.vmem [shape: f32[1,128], index: 2, kind: input, shape index: {}]   ;;  %s583_s3 = inlined_call_operand.hbm [shape: f32[32,128], index: 3, kind: output, shape index: {}]  }
   0x1   :  { %10 = vsyncpa [#allocation3 + $0x1], 0  ;;  %s481_s12 = smov 0   ;;  %s483_s13 = smov 0  }
   0x2   :  { %s485_s14 = smov 0   ;;  %s487_s15 = smov 0  }
   0x3 LB: > { %s502_s16 = sadd.s32 4294967295, %s457_s15   ;;  %s314_s17 = sadd.s32 4294967294, %s457_s15   ;;  %s457_s15 = sphi %s487_s15, %s589_s15   ;;  %s453_s14 = sphi %s485_s14, %s588_s14   ;;  %s449_s13 = sphi %s483_s13, %s587_s13   ;;  %s445_s12 = sphi %s481_s12, %s586_s12  }
   0x4   : > { %s506_s18 = sadd.s32 1, %s457_s15   ;;  %s91_s19 = sadd.s32 1, %s453_s14 }
   0x5   : > { %s88_s20 = ssub.s32 %s457_s15, %s506_s18  ;;  %p101_p0 = scmp.ne.s32.totalorder %s453_s14, %s449_s13 }
   0x6   : > { %p89_p1 = scmp.eq.s32.totalorder %s88_s20, 0  ;;  %p102_p2 = scmp.eq.s32.totalorder %s502_s16, 1 }
   0x7   : > { %p107_p3 = scmp.ne.s32.totalorder %s449_s13, %s445_s12  ;;  %p108_p4 = scmp.eq.s32.totalorder %s314_s17, 1 }
   0x8   : > { %s517_s21 = scalar_select %p89_p1, %s453_s14, %s91_s19  }
   0x9   : > { %p519_p5 = por %p102_p2, %p101_p0  ;;  %p523_p6 = por %p108_p4, %p107_p3 }
   0xa   : > { %p317_p7 = scmp.ge.s32.totalorder %s457_s15, 1  ;;  %p141_p8 = scmp.lt.s32.totalorder %s457_s15, 3 }
   0xc   : > { %p142_p9 = pnand %p317_p7, %p141_p8 }
   0xd   : > { %s319_s26 = sshll.u32 (!%p142_p9), %s502_s16, 1  ;;  %s162_s10 = sand.u32 (!%p142_p9), 1, %s449_s13  }
   0xe   : > { %145 = sbr.rel (%p142_p9) target bundleno = 175 (0xaf), region = 32  ;;  %p166_p10 = scmp.lt.s32.totalorder (!%p142_p9), %s319_s26, 3 }
   0xf   : > { %s318_s11 = sshll.u32 (!%p142_p9), %s162_s10, 4  ;;  %s352_s20 = sshll.u32 (!%p142_p9), %s502_s16, 4 }
  0x10   : > { %s164_s27 = scalar_lea.vmem (!%p142_p9), [#allocation2], %s318_s11  ;;  %s237_s30 = scalar_lea.sflag (!%p142_p9), [#allocation3], %s162_s10 }
  0x11   : > { %s249_s28 = sshll.u32 (!%p142_p9), %s164_s27, 4  ;;  %s415_s7 = scalar_lea.hbm (!%p142_p9), %s583_s3, 32  ;;  %s250_s28 = int_to_ptr.vmem [resolvable:$true] %s249_s28 }
  0x13   : > { %v351_v0 = vld [vmem:[%s581_s1 + $0x18] sm:$0xff]  ;;  %v350_v1 = vld [vmem:[%s581_s1 + $0x10] sm:$0xff]  ;;  %s591_s26 = smov (!%p166_p10, %s319_s26), 3  ;;  %v349_v2 = vld [vmem:[%s581_s1 + $0x8] sm:$0xff]  ;;  %vm216_vm0 = vcmask 523264  }
  0x14   : > { %224 = vmatpush.bf16.msra.mxu0 %v351_v0  ;;  %s320_s4 = sshll.u32 %s591_s26, 2  ;;  %v348_v3 = vld [vmem:[%s581_s1] sm:$0xff]  ;;  %s248_s26 = scalar_lea.hbm %s583_s3, %s352_s20 }
  0x15   : > { %s169_s9 = scalar_lea.vmem %s580_s0, %s320_s4  ;;  %v394_v5 = vld [vmem:[%s582_s2] ss:$0 sm:$0xff]  ;;  %s251_s29 = sshll.u32 %s248_s26, 4  ;;  %s252_s29 = int_to_ptr.hbm [resolvable:$true] %s251_s29 }
  0x16   : > { %v347_v4 = vld [vmem:[%s169_s9] sm:$0xff]  ;;  %s409_s4 = sshra.s32 %s252_s29, 4  ;;  %s410_s4 = int_to_ptr.hbm [resolvable:$true] %s409_s4 }
  0x17   : > { %s411_s16 = scalar_lea.hbm %s410_s4, 16  ;;  %p416_p0 = scmp.lt.s32.totalorder %s410_s4, %s583_s3 }
  0x18   : > { %225 = vmatpush.bf16.msra.mxu0 %v350_v1  ;;  %p412_p11 = scmp.ne.s32.totalorder %s410_s4, %s411_s16  ;;  %p417_p1 = scmp.lt.s32.totalorder %s415_s7, %s411_s16 }
  0x1a   : > { %p413_p12 = pnand %p412_p11, %p519_p5  ;;  %p418_p2 = por %p417_p1, %p416_p0 }
  0x1c   : > { %226 = vmatpush.bf16.msra.mxu0 %v349_v2  ;;  %p414_p13 = pneg %p413_p12 }
  0x1e   : > { %p419_p3 = pnand %p418_p2, %p414_p13 }
  0x20   : > { %227 = vmatpush.bf16.msra.mxu0 %v348_v3 }
  0x23   : > { %341 = vmatmul.msk.bf16.vlgmr.msra.gmra.mxu0 %vm216_vm0, %v347_v4 }
  0xa0   : > { %v229_v6 = vpop.f32.mrf.mxu0 }
  0xa1   : > { %v230_v7 = vadd.f32 %v394_v5, %v229_v6 }
  0xa3   : > { %234 = vst [vmem:[%s164_s27] sm:$0xff] %v230_v7 }
  0xa8   : > { %v231_v8 = vpop.f32.mrf.mxu0 }
  0xa9   : > { %v232_v9 = vadd.f32 %v394_v5, %v231_v8 }
  0xab   : > { %235 = vst [vmem:[%s164_s27 + $0x8] sm:$0xff] %v232_v9 }
  0xac   : > { %422 = shalt.err (!%p419_p3)
}
  0xad   : > { %s459_s10 = smov 128   ;;  %s460_s11 = smov 8  }
  0xae   : > { %353 = dma.vmem_to_hbm [thread:$0]  (%p519_p5), %s250_s28, 256, %s252_s29, %s237_s30, %s459_s10, %s459_s10, %s460_s11  }
  0xaf PF: > { %p359_p4 = scmp.ge.s32.totalorder %s457_s15, 2  ;;  %s266_s17 = sand.u32 1, %s445_s12  }
  0xb0   : > { %s267_s19 = scalar_lea.sflag [#allocation3], %s266_s17 }
  0xb1   : > { %p356_p7 = pnand %p359_p4, %p523_p6 }
  0xb3   : > { %p357_p8 = pneg %p356_p7 }
  0xb5   : > { %440 = dma.done.wait (%p357_p8), %s267_s19, 256  }
  0xb6   : > { %442 = vsyncadd (%p357_p8), %s267_s19, 4294967040  ;;  %p13_p9 = scmp.ge.s32.totalorder %s506_s18, 4   ;;  %s586_s12 = smov %s449_s13 }
  0xb7   : > { %s587_s13 = smov %s453_s14  ;;  %s588_s14 = smov %s517_s21 }
  0xb8   : > { %s589_s15 = smov %s506_s18  ;;  %15 = sbr.rel (!%p13_p9) target bundleno = 3 (0x3), region = 67 }
  0xbd   :  { %273 = vsyncpa [#allocation3], 1 }
  0xbe   :  { %275 = vsyncpa [#allocation3 + $0x1], 1 }

</bundles_post_ra>
